<compile_context>
chip_gen: v7x
topology: tpu7x:2x2x1
jax: 0.10.0
libtpu: 0.0.40
codegen_flags: <defaults>
</compile_context>

<pallas_src>
import jax
import jax.numpy as jnp
from jax.experimental import pallas as pl
from jax.experimental.pallas import tpu as pltpu


def _inv_denom_kernel(x_ref, inv_ref, acc_ref):
    """Pass 1: accumulate sum_k exp(x[row, k]) over column tiles, then invert."""
    k = pl.program_id(1)

    @pl.when(k == 0)
    def _():
        acc_ref[...] = jnp.zeros_like(acc_ref)

    x = x_ref[...].astype(jnp.float32)
    acc_ref[...] += jnp.sum(jnp.exp(x), axis=-1, keepdims=True)

    @pl.when(k == pl.num_programs(1) - 1)
    def _():
        d = acc_ref[...]
        inv = pl.reciprocal(d, approx=True)   # EUP; only B values total
        inv = inv * (2.0 - d * inv)           # one Newton step -> meets 1e-5 tol
        inv_ref[...] = inv


def _scale_kernel(x_ref, inv_ref, o_ref):
    """Pass 2: y = exp(x) * inv_denom[col] (sublane broadcast of (1, TN) row)."""
    x = x_ref[...].astype(jnp.float32)
    o_ref[...] = (jnp.exp(x) * inv_ref[...]).astype(o_ref.dtype)


def _pick_tile(dim, target, align):
    """Largest multiple of `align` that divides `dim` and is <= target, else full dim."""
    if dim <= target:
        return dim
    t = (target // align) * align
    while t >= align:
        if dim % t == 0:
            return t
        t -= align
    return dim  # fall back to a full-extent (untiled) block


def softmax_pallas(x, block_rows=512, block_cols=2048):
    assert x.ndim == 2 and x.shape[0] == x.shape[1], (
        "reference module's missing keepdim only broadcasts for square 2-D inputs"
    )
    B, N = x.shape
    tm = _pick_tile(B, block_rows, 8)     # sublane-aligned row tile
    tn = _pick_tile(N, block_cols, 128)   # lane-aligned column tile
    grid = (B // tm, N // tn)

    # ---- pass 1: inv_denom[j] = 1 / sum_k exp(x[j, k]), stored as (B, 1) f32 ----
    inv_col = pl.pallas_call(
        _inv_denom_kernel,
        out_shape=jax.ShapeDtypeStruct((B, 1), jnp.float32),
        grid_spec=pltpu.PrefetchScalarGridSpec(
            num_scalar_prefetch=0,
            grid=grid,
            in_specs=[pl.BlockSpec((tm, tn), lambda i, k: (i, k))],
            out_specs=pl.BlockSpec((tm, 1), lambda i, k: (i, 0)),
            scratch_shapes=[pltpu.VMEM((tm, 1), jnp.float32)],
        ),
        compiler_params=pltpu.CompilerParams(
            dimension_semantics=("parallel", "arbitrary")),
        cost_estimate=pl.CostEstimate(
            flops=B * N, transcendentals=B * N + B,
            bytes_accessed=4 * B * N + 4 * B),
    )(x)

    # (B, 1) -> (1, N): free row-major reshape (B == N); keeps pass 2's
    # denominator lane-aligned so no cross-lane transpose happens per block.
    inv_row = inv_col.reshape(1, N)

    # ---- pass 2: y[i, j] = exp(x[i, j]) * inv_denom[j] ----
    y = pl.pallas_call(
        _scale_kernel,
        out_shape=jax.ShapeDtypeStruct((B, N), x.dtype),
        grid_spec=pltpu.PrefetchScalarGridSpec(
            num_scalar_prefetch=0,
            grid=grid,
            in_specs=[pl.BlockSpec((tm, tn), lambda i, j: (i, j)),
                      pl.BlockSpec((1, tn), lambda i, j: (0, j))],
            out_specs=pl.BlockSpec((tm, tn), lambda i, j: (i, j)),
        ),
        compiler_params=pltpu.CompilerParams(
            dimension_semantics=("parallel", "parallel")),
        cost_estimate=pl.CostEstimate(
            flops=B * N, transcendentals=B * N,
            bytes_accessed=8 * B * N + 4 * N),
    )(x, inv_row)
    return y


if __name__ == "__main__":
    key = jax.random.PRNGKey(0)
    # Square input (required by the reference's missing-keepdim broadcast).
    N = 256
    x = jax.random.normal(key, (N, N), dtype=jnp.float32)

    # Small tiles here just to exercise the 2x2 grid; production defaults are
    # block_rows=512, block_cols=2048 (4 MiB f32 tile).
    y = softmax_pallas(x, block_rows=128, block_cols=128)
    y = jax.block_until_ready(y)

    # Pure-JAX reference with the exact same (quirky) semantics.
    e = jnp.exp(x)
    y_ref = e / jnp.sum(e, axis=-1)
    assert y.shape == x.shape and y.dtype == x.dtype
    assert jnp.allclose(y, y_ref, rtol=1e-5, atol=1e-5), float(
        jnp.max(jnp.abs(y - y_ref)))

    print("KERNEL_OK")
</pallas_src>

<mosaic_0001>
module attributes {stable_mosaic.version = 11 : i64} {
  func.func @_inv_denom_kernel(%arg0: i32, %arg1: i32, %arg2: memref<128x128xf32, #tpu.memory_space<vmem>>, %arg3: memref<128x1xf32, #tpu.memory_space<vmem>>, %arg4: memref<128x1xf32, #tpu.memory_space<vmem>>) attributes {dimension_semantics = [#tpu.dimension_semantics<parallel>, #tpu.dimension_semantics<arbitrary>], iteration_bounds = array<i64: 2, 2>, scalar_prefetch = 0 : i64, scratch_operands = 1 : i64, tpu.core_type = #tpu.core_type<tc>, window_params = [{transform_indices = @transform_0, window_bounds = array<i64: 128, 128>}, {transform_indices = @transform_1, window_bounds = array<i64: 128, 1>}]} {
    %c0_i32 = arith.constant 0 : i32
    %0 = arith.cmpi eq, %arg1, %c0_i32 : i32
    %1 = arith.extui %0 : i1 to i32
    %c0_i32_0 = arith.constant 0 : i32
    %2 = arith.cmpi ne, %1, %c0_i32_0 : i32
    scf.if %2 {
      %cst_7 = arith.constant 0.000000e+00 : f32
      %13 = vector.broadcast %cst_7 : f32 to vector<128x1xf32>
      %c0_8 = arith.constant 0 : index
      %c0_9 = arith.constant 0 : index
      %14 = vector.load %arg4[%c0_8, %c0_9] : memref<128x1xf32, #tpu.memory_space<vmem>>, vector<128x1xf32>
      tpu.vector_store %arg4[%c0_8, %c0_9], %13 {strides = array<i32>} : memref<128x1xf32, #tpu.memory_space<vmem>>, vector<128x1xf32>,
    } else {
    }
    %c0 = arith.constant 0 : index
    %c0_1 = arith.constant 0 : index
    %3 = vector.load %arg2[%c0, %c0_1] : memref<128x128xf32, #tpu.memory_space<vmem>>, vector<128x128xf32>
    %c0_2 = arith.constant 0 : index
    %c0_3 = arith.constant 0 : index
    %4 = vector.load %arg4[%c0_2, %c0_3] : memref<128x1xf32, #tpu.memory_space<vmem>>, vector<128x1xf32>
    %5 = math.exp %3 : vector<128x128xf32>
    %cst = arith.constant dense<0.000000e+00> : vector<128xf32>
    %6 = vector.multi_reduction <add>, %5, %cst [1] : vector<128x128xf32> to vector<128xf32>
    %7 = vector.shape_cast %6 : vector<128xf32> to vector<128x1xf32>
    %8 = arith.addf %4, %7 : vector<128x1xf32>
    %c0_4 = arith.constant 0 : index
    %c0_5 = arith.constant 0 : index
    %9 = vector.load %arg4[%c0_4, %c0_5] : memref<128x1xf32, #tpu.memory_space<vmem>>, vector<128x1xf32>
    tpu.vector_store %arg4[%c0_4, %c0_5], %8 {strides = array<i32>} : memref<128x1xf32, #tpu.memory_space<vmem>>, vector<128x1xf32>,
    %c1_i32 = arith.constant 1 : i32
    %10 = arith.cmpi eq, %arg1, %c1_i32 : i32
    %11 = arith.extui %10 : i1 to i32
    %c0_i32_6 = arith.constant 0 : i32
    %12 = arith.cmpi ne, %11, %c0_i32_6 : i32
    scf.if %12 {
      %c0_7 = arith.constant 0 : index
      %c0_8 = arith.constant 0 : index
      %13 = vector.load %arg4[%c0_7, %c0_8] : memref<128x1xf32, #tpu.memory_space<vmem>>, vector<128x1xf32>
      %14 = tpu.reciprocal %13 {approx = true} : vector<128x1xf32> -> vector<128x1xf32>
      %15 = arith.mulf %13, %14 : vector<128x1xf32>
      %cst_9 = arith.constant 2.000000e+00 : f32
      %16 = vector.broadcast %cst_9 : f32 to vector<128x1xf32>
      %17 = arith.subf %16, %15 : vector<128x1xf32>
      %18 = arith.mulf %14, %17 : vector<128x1xf32>
      %c0_10 = arith.constant 0 : index
      %c0_11 = arith.constant 0 : index
      %19 = vector.load %arg3[%c0_10, %c0_11] : memref<128x1xf32, #tpu.memory_space<vmem>>, vector<128x1xf32>
      tpu.vector_store %arg3[%c0_10, %c0_11], %18 {strides = array<i32>} : memref<128x1xf32, #tpu.memory_space<vmem>>, vector<128x1xf32>,
    } else {
    }
    return
  }
  func.func @transform_0(%arg0: i32, %arg1: i32) -> (i32, i32) {
    %c0_i32 = arith.constant 0 : i32
    return %arg0, %arg1 : i32, i32
  }
  func.func @transform_1(%arg0: i32, %arg1: i32) -> (i32, i32) {
    %c0_i32 = arith.constant 0 : i32
    %c0_i32_0 = arith.constant 0 : i32
    return %arg0, %c0_i32 : i32, i32
  }
}

</mosaic_0001>

<bundles_post_ra>
// kernel: tpu_custom_call.1
= control target key start
LH: loop header
LB: loop body
LE: loop exit
PB: predicated region body
PF: predicated region fallthrough
CT: control target
= control target key end

     0   :  { %6 = vsyncpa [#allocation4], 0  ;;  %s1007_s0 = inlined_call_operand.hbm [shape: f32[256,256], index: 0, kind: input, shape index: {}]   ;;  %s1008_s1 = inlined_call_operand.vmem [shape: f32[256,1], index: 1, kind: output, shape index: {}]  }
   0x1   :  { %8 = vsyncpa [#allocation4 + $0x1], 0  ;;  %s755_s6 = smov 0   ;;  %s757_s7 = smov 0  }
   0x2   :  { %s759_s8 = smov 0   ;;  %s761_s9 = smov 0  }
   0x3   :  { %s763_s10 = smov 0   ;;  %s765_s11 = smov 0  }
   0x4   :  { %s767_s12 = smov 0   ;;  %s769_s13 = smov 0  }
   0x5 LB: > { %s486_s14 = sadd.s32 4294967295, %s738_s13   ;;  %s23_s15 = sadd.s32 1, %s730_s11  ;;  %s738_s13 = sphi %s769_s13, %s14_s13   ;;  %s734_s12 = sphi %s767_s12, %s1019_s12   ;;  %s730_s11 = sphi %s765_s11, %s1018_s11   ;;  %s726_s10 = sphi %s763_s10, %s1017_s10   ;;  %s722_s9 = sphi %s761_s9, %s1016_s9   ;;  %s718_s8 = sphi %s759_s8, %s1015_s8   ;;  %s714_s7 = sphi %s757_s7, %s1014_s7   ;;  %s710_s6 = sphi %s755_s6, %s1013_s6  }
   0x6   : > { %p24_p0 = scmp.ge.s32.totalorder %s23_s15, 2  ;;  %s26_s16 = sadd.s32 1, %s734_s12 }
   0x7   : > { %s35_s17 = sadd.s32 1, %s718_s8  ;;  %p42_p1 = scmp.ne.s32.totalorder %s718_s8, %s714_s7 }
   0x8   : > { %s1021_s15 = smov (%p24_p0, %s23_s15), 0  ;;  %s1023_s16 = smov (!%p24_p0, %s26_s16), %s734_s12 }
   0x9   : > { %s31_s18 = ssub.s32 %s730_s11, %s1021_s15  ;;  %p43_p2 = scmp.eq.s32.totalorder %s738_s13, 0 }
   0xa   : > { %p28_p3 = scmp.ge.s32.totalorder %s1023_s16, 2  ;;  %p48_p4 = scmp.ne.s32.totalorder %s714_s7, %s710_s6 }
   0xb   : > { %p806_p5 = por %p43_p2, %p42_p1  ;;  %p49_p6 = scmp.eq.s32.totalorder %s486_s14, 0 }
   0xc   : > { %s1025_s16 = smov (%p28_p3, %s1023_s16), 0  ;;  %p509_p8 = scmp.lt.s32.totalorder %s738_s13, 4 }
   0xd   : > { %p812_p7 = por %p49_p6, %p48_p4  ;;  %s30_s21 = ssub.s32 %s734_s12, %s1025_s16 }
   0xe   : > { %s32_s22 = sor.u32 %s31_s18, %s30_s21  ;;  %s98_s23 = sand.u32 1, %s718_s8  }
   0xf   : > { %p33_p9 = scmp.eq.s32.totalorder %s32_s22, 0  ;;  %s490_s24 = sshll.u32 %s98_s23, 7 }
  0x10   : > { %s502_s25 = sshll.u32 %s734_s12, 5  ;;  %s102_s29 = scalar_lea.vmem [#allocation3], %s490_s24 }
  0x11   : > { %s822_s26 = scalar_select %p33_p9, %s718_s8, %s35_s17  }
  0x12   : > { %s108_s27 = sadd.s32 %s730_s11, %s502_s25  ;;  %s111_s30 = sshll.u32 %s102_s29, 4  ;;  %s830_s30 = int_to_ptr.vmem [resolvable:$true] %s111_s30 }
  0x13   : > { %s493_s28 = sshll.u32 %s108_s27, 7  ;;  %p836_p10 = pnand %p509_p8, %p806_p5 }
  0x14   : > { %s828_s4 = scalar_lea.hbm %s1007_s0, %s493_s28  ;;  %s841_s6 = scalar_lea.sflag [#allocation4], %s98_s23 }
  0x15   : > { %s642_s14 = scalar_lea.hbm %s828_s4, 2048  ;;  %p644_p13 = pneg %p836_p10 }
  0x16   : > { %p643_p12 = scmp.ne.s32.totalorder %s828_s4, %s642_s14  ;;  %s647_s19 = scalar_lea.hbm %s1007_s0, 8192 }
  0x17   : > { %p648_p2 = scmp.lt.u32.totalorder %s828_s4, %s1007_s0  ;;  %p649_p3 = scmp.lt.u32.totalorder %s647_s19, %s642_s14 }
  0x18   : > { %p645_p0 = pnand %p644_p13, %p643_p12  ;;  %p651_p5 = scmp.lt.u32.totalorder %s642_s14, %s828_s4 }
  0x19   : > { %p650_p4 = por %p649_p3, %p648_p2 }
  0x1a   : > { %p646_p1 = pneg %p645_p0 }
  0x1b   : > { %p652_p6 = por %p651_p5, %p650_p4 }
  0x1d   : > { %p653_p8 = pnand %p652_p6, %p646_p1 }
  0x1f   : > { %656 = shalt.err (!%p653_p8)
}
  0x20   : > { %s657_s23 = scalar_lea.vmem %s830_s30, 2048  ;;  %s740_s24 = smov [#allocation3]  }
  0x21   : > { %p658_p9 = scmp.ne.s32.totalorder %s830_s30, %s657_s23  ;;  %s662_s25 = sshll.u32 %s740_s24, 4  ;;  %s663_s25 = int_to_ptr.vmem [resolvable:$false] %s662_s25 }
  0x22   : > { %s664_s27 = scalar_lea.vmem %s663_s25, 4096  ;;  %p665_p11 = scmp.lt.s32.totalorder %s830_s30, %s663_s25 }
  0x23   : > { %p660_p12 = pnand %p658_p9, %p644_p13  ;;  %p666_p2 = scmp.lt.s32.totalorder %s664_s27, %s657_s23 }
  0x25   : > { %p661_p0 = pneg %p660_p12  ;;  %p667_p3 = por %p666_p2, %p665_p11 }
  0x27   : > { %p668_p4 = pnand %p667_p3, %p661_p0 }
  0x29   : > { %671 = shalt.err (!%p668_p4)
}
  0x2a   : > { %s741_s28 = smov 256   ;;  %s742_s29 = smov 128  }
  0x2b   : > { %s743_s2 = smov 8   ;;  %p119_p13 = scmp.lt.s32.totalorder %s738_s13, 5 }
  0x2c   : > { %508 = dma.hbm_to_vmem [thread:$0]  (!%p836_p10), %s828_s4, 2048, %s830_s30, %s841_s6, %s741_s28, %s742_s29, %s743_s2  }
  0x2d   : > { %p1012_p1 = scmp.ge.s32.totalorder %s738_s13, 1 }
  0x2f   : > { %p120_p5 = pnand %p1012_p1, %p119_p13 }
  0x30   : > { %s125_s3 = sand.u32 (!%p120_p5), 1, %s714_s7  }
  0x31   : > { %123 = sbr.rel (%p120_p5) target bundleno = 281 (0x119), region = 24  ;;  %s495_s14 = sshll.u32 (!%p120_p5), %s125_s3, 7 }
  0x32   : > { %s126_s17 = scalar_lea.sflag (!%p120_p5), [#allocation4], %s125_s3  ;;  %s873_s18 = scalar_lea.vmem (!%p120_p5), [#allocation3], %s495_s14 }
  0x38   : > { %705 = dma.done.wait (%p812_p7), %s126_s17, 2048  }
  0x39   : > { %707 = vsyncadd (%p812_p7), %s126_s17, 4294965248  ;;  %s496_s19 = sshll.u32 %s726_s10, 4  ;;  %p498_p10 = scmp.ne.s32.totalorder %s722_s9, 0 }
  0x3a   : > { %p150_p11 = scmp.lt.s32.totalorder %s496_s19, 31  ;;  %vm159_vm0 = vcmask (!%p498_p10), 7168   ;;  %v744_v0 = vmov (!%p498_p10), 0.0  }
  0x3b   : > { %158 = sbr.rel (%p498_p10) target bundleno = 67 (0x43), region = 32  ;;  %160 = vst.msk [vmem:[#allocation2] sm:$0xff] (!%p498_p10), %vm159_vm0, %v744_v0  ;;  %161 = vst.msk [vmem:[#allocation2 + $0x8] sm:$0xff] (!%p498_p10), %vm159_vm0, %v744_v0 }
  0x3c   : > { %s1027_s19 = smov (!%p150_p11, %s496_s19), 31  ;;  %162 = vst.msk [vmem:[#allocation2 + $0x10] sm:$0xff] (!%p498_p10), %vm159_vm0, %v744_v0  ;;  %163 = vst.msk [vmem:[#allocation2 + $0x18] sm:$0xff] (!%p498_p10), %vm159_vm0, %v744_v0 }
  0x3d   : > { %s497_s30 = sshll.u32 %s1027_s19, 3  ;;  %164 = vst.msk [vmem:[#allocation2 + $0x20] sm:$0xff] (!%p498_p10), %vm159_vm0, %v744_v0  ;;  %165 = vst.msk [vmem:[#allocation2 + $0x28] sm:$0xff] (!%p498_p10), %vm159_vm0, %v744_v0 }
  0x3e   : > { %s883_s6 = scalar_lea.vmem %s1008_s1, %s497_s30  ;;  %166 = vst.msk [vmem:[#allocation2 + $0x30] sm:$0xff] (!%p498_p10), %vm159_vm0, %v744_v0  ;;  %167 = vst.msk [vmem:[#allocation2 + $0x38] sm:$0xff] (!%p498_p10), %vm159_vm0, %v744_v0 }
  0x3f   : > { %168 = vst.msk [vmem:[#allocation2 + $0x40] sm:$0xff] (!%p498_p10), %vm159_vm0, %v744_v0  ;;  %169 = vst.msk [vmem:[#allocation2 + $0x48] sm:$0xff] (!%p498_p10), %vm159_vm0, %v744_v0 }
  0x40   : > { %170 = vst.msk [vmem:[#allocation2 + $0x50] sm:$0xff] (!%p498_p10), %vm159_vm0, %v744_v0  ;;  %171 = vst.msk [vmem:[#allocation2 + $0x58] sm:$0xff] (!%p498_p10), %vm159_vm0, %v744_v0 }
  0x41   : > { %172 = vst.msk [vmem:[#allocation2 + $0x60] sm:$0xff] (!%p498_p10), %vm159_vm0, %v744_v0  ;;  %173 = vst.msk [vmem:[#allocation2 + $0x68] sm:$0xff] (!%p498_p10), %vm159_vm0, %v744_v0 }
  0x42   : > { %174 = vst.msk [vmem:[#allocation2 + $0x70] sm:$0xff] %vm159_vm0, %v744_v0  ;;  %175 = vst.msk [vmem:[#allocation2 + $0x78] sm:$0xff] %vm159_vm0, %v744_v0 }
  0x43 PF: > { %v178_v1 = vld [vmem:[%s873_s18 + $0x10] sm:$0xff]  ;;  %v176_v2 = vld [vmem:[%s873_s18] sm:$0xff]  ;;  %v179_v3 = vld [vmem:[%s873_s18 + $0x18] sm:$0xff]  ;;  %vm288_vm1 = vcmask 7168   ;;  %p499_p7 = scmp.ne.s32.totalorder %s722_s9, 1 }
  0x44   : > { %v212_v4 = vmul.f32 1.442695, %v178_v1  ;;  %v208_v5 = vmul.f32 1.442695, %v176_v2  ;;  %v214_v6 = vmul.f32 1.442695, %v179_v3 }
  0x45   : > { %v177_v7 = vld [vmem:[%s873_s18 + $0x8] sm:$0xff]  ;;  %v180_v10 = vld [vmem:[%s873_s18 + $0x20] sm:$0xff]  ;;  %v183_v13 = vld [vmem:[%s873_s18 + $0x38] sm:$0xff] }
  0x46   : > { %v181_v8 = vld [vmem:[%s873_s18 + $0x28] sm:$0xff]  ;;  %578 = vpow2.f32 %v212_v4  ;;  %v210_v9 = vmul.f32 1.442695, %v177_v7  ;;  %v216_v12 = vmul.f32 1.442695, %v180_v10  ;;  %v182_v14 = vld [vmem:[%s873_s18 + $0x30] sm:$0xff] }
  0x47   : > { %580 = vpow2.f32 %v208_v5  ;;  %v218_v11 = vmul.f32 1.442695, %v181_v8  ;;  %v222_v15 = vmul.f32 1.442695, %v183_v13  ;;  %v220_v16 = vmul.f32 1.442695, %v182_v14 }
  0x48   : > { %582 = vpow2.f32 %v214_v6  ;;  %v185_v17 = vld [vmem:[%s873_s18 + $0x48] sm:$0xff]  ;;  %v184_v18 = vld [vmem:[%s873_s18 + $0x40] sm:$0xff]  ;;  %v187_v23 = vld [vmem:[%s873_s18 + $0x58] sm:$0xff] }
  0x49   : > { %584 = vpow2.f32 %v210_v9  ;;  %v226_v20 = vmul.f32 1.442695, %v185_v17  ;;  %v224_v22 = vmul.f32 1.442695, %v184_v18  ;;  %v186_v25 = vld [vmem:[%s873_s18 + $0x50] sm:$0xff]  ;;  %v189_v29 = vld [vmem:[%s873_s18 + $0x68] sm:$0xff] }
  0x4a   : > { %586 = vpow2.f32 %v218_v11  ;;  %v230_v27 = vmul.f32 1.442695, %v187_v23  ;;  %v228_v28 = vmul.f32 1.442695, %v186_v25  ;;  %v188_v31 = vld [vmem:[%s873_s18 + $0x60] sm:$0xff]  ;;  %v191_v35 = vld [vmem:[%s873_s18 + $0x78] sm:$0xff] }
  0x4b   : > { %588 = vpow2.f32 %v216_v12  ;;  %v234_v33 = vmul.f32 1.442695, %v189_v29  ;;  %v232_v34 = vmul.f32 1.442695, %v188_v31  ;;  %v190_v37 = vld [vmem:[%s873_s18 + $0x70] sm:$0xff]  ;;  %v192_v50 = vld [vmem:[#allocation2] sm:$0xff] }
  0x4c   : > { %590 = vpow2.f32 %v222_v15  ;;  %v238_v39 = vmul.f32 1.442695, %v191_v35  ;;  %v236_v40 = vmul.f32 1.442695, %v190_v37  ;;  %v194_v49 = vld [vmem:[#allocation2 + $0x10] sm:$0xff]  ;;  %v195_v55 = vld [vmem:[#allocation2 + $0x18] sm:$0xff] }
  0x4d   : > { %592 = vpow2.f32 %v220_v16  ;;  %v193_v56 = vld [vmem:[#allocation2 + $0x8] sm:$0xff]  ;;  %v196_v62 = vld [vmem:[#allocation2 + $0x20] sm:$0xff]  ;;  %v199_v3 = vld [vmem:[#allocation2 + $0x38] sm:$0xff] }
  0x4e   : > { %594 = vpow2.f32 %v226_v20  ;;  %v197_v61 = vld [vmem:[#allocation2 + $0x28] sm:$0xff]  ;;  %v198_v4 = vld [vmem:[#allocation2 + $0x30] sm:$0xff]  ;;  %v200_v10 = vld [vmem:[#allocation2 + $0x40] sm:$0xff] }
  0x4f   : > { %596 = vpow2.f32 %v224_v22  ;;  %v201_v9 = vld [vmem:[#allocation2 + $0x48] sm:$0xff]  ;;  %v203_v15 = vld [vmem:[#allocation2 + $0x58] sm:$0xff]  ;;  %v202_v16 = vld [vmem:[#allocation2 + $0x50] sm:$0xff] }
  0x50   : > { %v579_v19 = vpop.eup %578  ;;  %598 = vpow2.f32 %v230_v27  ;;  %v204_v22 = vld [vmem:[#allocation2 + $0x60] sm:$0xff]  ;;  %v207_v27 = vld [vmem:[#allocation2 + $0x78] sm:$0xff] }
  0x51   : > { %v581_v21 = vpop.eup %580  ;;  %244 = vadd.xlane.f32.xlu1 %v579_v19  ;;  %600 = vpow2.f32 %v228_v28  ;;  %v206_v28 = vld [vmem:[#allocation2 + $0x70] sm:$0xff] }
  0x52   : > { %v583_v24 = vpop.eup %582  ;;  %240 = vadd.xlane.f32.xlu0 %v581_v21  ;;  %602 = vpow2.f32 %v234_v33  ;;  %v205_v21 = vld [vmem:[#allocation2 + $0x68] sm:$0xff] }
  0x53   : > { %v585_v26 = vpop.eup %584  ;;  %604 = vpow2.f32 %v232_v34 }
  0x54   : > { %v587_v30 = vpop.eup %586  ;;  %606 = vpow2.f32 %v238_v39 }
  0x55   : > { %246 = vadd.xlane.f32.xlu1 %v583_v24  ;;  %v589_v32 = vpop.eup %588  ;;  %608 = vpow2.f32 %v236_v40 }
  0x56   : > { %242 = vadd.xlane.f32.xlu0 %v585_v26  ;;  %v591_v36 = vpop.eup %590 }
  0x57   : > { %v593_v38 = vpop.eup %592 }
  0x58   : > { %v595_v41 = vpop.eup %594 }
  0x59   : > { %250 = vadd.xlane.f32.xlu1 %v587_v30  ;;  %v597_v42 = vpop.eup %596 }
  0x5a   : > { %248 = vadd.xlane.f32.xlu0 %v589_v32  ;;  %v599_v43 = vpop.eup %598 }
  0x5b   : > { %v601_v44 = vpop.eup %600 }
  0x5c   : > { %v603_v45 = vpop.eup %602 }
  0x5d   : > { %254 = vadd.xlane.f32.xlu1 %v591_v36  ;;  %v605_v46 = vpop.eup %604 }
  0x5e   : > { %252 = vadd.xlane.f32.xlu0 %v593_v38  ;;  %v607_v47 = vpop.eup %606 }
  0x5f   : > { %v609_v48 = vpop.eup %608 }
  0x61   : > { %258 = vadd.xlane.f32.xlu1 %v595_v41 }
  0x62   : > { %256 = vadd.xlane.f32.xlu0 %v597_v42 }
  0x65   : > { %262 = vadd.xlane.f32.xlu1 %v599_v43 }
  0x66   : > { %260 = vadd.xlane.f32.xlu0 %v601_v44 }
  0x69   : > { %266 = vadd.xlane.f32.xlu1 %v603_v45 }
  0x6a   : > { %264 = vadd.xlane.f32.xlu0 %v605_v46 }
  0x6d   : > { %270 = vadd.xlane.f32.xlu1 %v607_v47 }
  0x6e   : > { %268 = vadd.xlane.f32.xlu0 %v609_v48 }
  0xde   : > { %v245_v51 = vpop.xlane.xlu1 %244 }
  0xdf   : > { %v274_v52 = vadd.f32 %v245_v51, %v194_v49  ;;  %v241_v53 = vpop.xlane.xlu0 %240 }
  0xe0   : > { %v272_v54 = vadd.f32 %v241_v53, %v192_v50 }
  0xe1   : > { %291 = vst.msk [vmem:[#allocation2 + $0x10] sm:$0xff] %vm288_vm1, %v274_v52 }
  0xe2   : > { %289 = vst.msk [vmem:[#allocation2] sm:$0xff] %vm288_vm1, %v272_v54  ;;  %v247_v57 = vpop.xlane.xlu1 %246 }
  0xe3   : > { %v275_v58 = vadd.f32 %v247_v57, %v195_v55  ;;  %v243_v59 = vpop.xlane.xlu0 %242 }
  0xe4   : > { %v273_v60 = vadd.f32 %v243_v59, %v193_v56 }
  0xe5   : > { %292 = vst.msk [vmem:[#allocation2 + $0x18] sm:$0xff] %vm288_vm1, %v275_v58 }
  0xe6   : > { %290 = vst.msk [vmem:[#allocation2 + $0x8] sm:$0xff] %vm288_vm1, %v273_v60  ;;  %v251_v63 = vpop.xlane.xlu1 %250 }
  0xe7   : > { %v277_v0 = vadd.f32 %v251_v63, %v197_v61  ;;  %v249_v1 = vpop.xlane.xlu0 %248 }
  0xe8   : > { %v276_v2 = vadd.f32 %v249_v1, %v196_v62  ;;  %v311_v35 = vld [vmem:[#allocation2 + $0x10] sm:$0xff] (!%p499_p7) }
  0xe9   : > { %294 = vst.msk [vmem:[#allocation2 + $0x28] sm:$0xff] %vm288_vm1, %v277_v0  ;;  %v309_v33 = vld [vmem:[#allocation2] sm:$0xff] (!%p499_p7) }
  0xea   : > { %293 = vst.msk [vmem:[#allocation2 + $0x20] sm:$0xff] %vm288_vm1, %v276_v2  ;;  %v255_v5 = vpop.xlane.xlu1 %254  ;;  %610 = vrcp.f32 (!%p499_p7), %v309_v33 }
  0xeb   : > { %v279_v6 = vadd.f32 %v255_v5, %v199_v3  ;;  %v253_v7 = vpop.xlane.xlu0 %252 }
  0xec   : > { %v278_v8 = vadd.f32 %v253_v7, %v198_v4  ;;  %v312_v36 = vld [vmem:[#allocation2 + $0x18] sm:$0xff] (!%p499_p7) }
  0xed   : > { %296 = vst.msk [vmem:[#allocation2 + $0x38] sm:$0xff] %vm288_vm1, %v279_v6  ;;  %v310_v34 = vld [vmem:[#allocation2 + $0x8] sm:$0xff] (!%p499_p7) }
  0xee   : > { %295 = vst.msk [vmem:[#allocation2 + $0x30] sm:$0xff] %vm288_vm1, %v278_v8  ;;  %v259_v11 = vpop.xlane.xlu1 %258  ;;  %612 = vrcp.f32 (!%p499_p7), %v310_v34 }
  0xef   : > { %v281_v12 = vadd.f32 %v259_v11, %v201_v9  ;;  %v257_v13 = vpop.xlane.xlu0 %256  ;;  %614 = vrcp.f32 (!%p499_p7), %v311_v35 }
  0xf0   : > { %v280_v14 = vadd.f32 %v257_v13, %v200_v10  ;;  %v314_v38 = vld [vmem:[#allocation2 + $0x28] sm:$0xff] (!%p499_p7)  ;;  %616 = vrcp.f32 (!%p499_p7), %v312_v36 }
  0xf1   : > { %298 = vst.msk [vmem:[#allocation2 + $0x48] sm:$0xff] %vm288_vm1, %v281_v12  ;;  %v313_v37 = vld [vmem:[#allocation2 + $0x20] sm:$0xff] (!%p499_p7) }
  0xf2   : > { %297 = vst.msk [vmem:[#allocation2 + $0x40] sm:$0xff] %vm288_vm1, %v280_v14  ;;  %v263_v17 = vpop.xlane.xlu1 %262  ;;  %618 = vrcp.f32 (!%p499_p7), %v313_v37 }
  0xf3   : > { %v283_v18 = vadd.f32 %v263_v17, %v203_v15  ;;  %v261_v19 = vpop.xlane.xlu0 %260  ;;  %620 = vrcp.f32 (!%p499_p7), %v314_v38 }
  0xf4   : > { %v282_v20 = vadd.f32 %v261_v19, %v202_v16  ;;  %v316_v40 = vld [vmem:[#allocation2 + $0x38] sm:$0xff] (!%p499_p7)  ;;  %v611_v46 = vpop.eup (!%p499_p7), %610 }
  0xf5   : > { %300 = vst.msk [vmem:[#allocation2 + $0x58] sm:$0xff] %vm288_vm1, %v283_v18  ;;  %v315_v39 = vld [vmem:[#allocation2 + $0x30] sm:$0xff] (!%p499_p7)  ;;  %v341_v49 = vmul.f32 (!%p499_p7), %v611_v46, %v309_v33 }
  0xf6   : > { %299 = vst.msk [vmem:[#allocation2 + $0x50] sm:$0xff] %vm288_vm1, %v282_v20  ;;  %v267_v23 = vpop.xlane.xlu1 %266  ;;  %622 = vrcp.f32 (!%p499_p7), %v315_v39 }
  0xf7   : > { %v285_v24 = vadd.f32 %v267_v23, %v205_v21  ;;  %v265_v25 = vpop.xlane.xlu0 %264  ;;  %624 = vrcp.f32 (!%p499_p7), %v316_v40  ;;  %v357_v55 = vsub.f32 (!%p499_p7), 2.0, %v341_v49 }
  0xf8   : > { %v284_v26 = vadd.f32 %v265_v25, %v204_v22  ;;  %308 = sbr.rel (%p499_p7) target bundleno = 281 (0x119), region = 36  ;;  %v318_v42 = vld [vmem:[#allocation2 + $0x48] sm:$0xff] (!%p499_p7)  ;;  %v613_v48 = vpop.eup (!%p499_p7), %612 }
  0xf9   : > { %302 = vst.msk [vmem:[#allocation2 + $0x68] sm:$0xff] %vm288_vm1, %v285_v24  ;;  %v317_v41 = vld [vmem:[#allocation2 + $0x40] sm:$0xff] (!%p499_p7)  ;;  %v615_v51 = vpop.eup (!%p499_p7), %614  ;;  %v342_v52 = vmul.f32 (!%p499_p7), %v613_v48, %v310_v34  ;;  %v373_v61 = vmul.f32 (!%p499_p7), %v611_v46, %v357_v55 }
  0xfa   : > { %301 = vst.msk [vmem:[#allocation2 + $0x60] sm:$0xff] %vm288_vm1, %v284_v26  ;;  %v271_v29 = vpop.xlane.xlu1 %270  ;;  %626 = vrcp.f32 (!%p499_p7), %v317_v41  ;;  %v617_v54 = vpop.eup (!%p499_p7), %616  ;;  %v343_v56 = vmul.f32 (!%p499_p7), %v615_v51, %v311_v35 }
  0xfb   : > { %v287_v30 = vadd.f32 %v271_v29, %v207_v27  ;;  %v269_v31 = vpop.xlane.xlu0 %268  ;;  %628 = vrcp.f32 (!%p499_p7), %v318_v42  ;;  %v358_v58 = vsub.f32 (!%p499_p7), 2.0, %v342_v52  ;;  %v344_v59 = vmul.f32 (!%p499_p7), %v617_v54, %v312_v36  ;;  %389 = vst.msk [vmem:[%s883_s6] sm:$0xff] (!%p499_p7), %vm288_vm1, %v373_v61 }
  0xfc   : > { %v286_v32 = vadd.f32 %v269_v31, %v206_v28  ;;  %v320_v44 = vld [vmem:[#allocation2 + $0x58] sm:$0xff] (!%p499_p7)  ;;  %v619_v57 = vpop.eup (!%p499_p7), %618  ;;  %v359_v62 = vsub.f32 (!%p499_p7), 2.0, %v343_v56 }
  0xfd   : > { %304 = vst.msk [vmem:[#allocation2 + $0x78] sm:$0xff] %vm288_vm1, %v287_v30  ;;  %v319_v43 = vld [vmem:[#allocation2 + $0x50] sm:$0xff] (!%p499_p7)  ;;  %v621_v60 = vpop.eup (!%p499_p7), %620  ;;  %v345_v63 = vmul.f32 (!%p499_p7), %v619_v57, %v313_v37  ;;  %v374_v1 = vmul.f32 (!%p499_p7), %v613_v48, %v358_v58  ;;  %v360_v2 = vsub.f32 (!%p499_p7), 2.0, %v344_v59 }
  0xfe   : > { %303 = vst.msk [vmem:[#allocation2 + $0x70] sm:$0xff] %vm288_vm1, %v286_v32  ;;  %630 = vrcp.f32 (!%p499_p7), %v319_v43  ;;  %v346_v3 = vmul.f32 (!%p499_p7), %v621_v60, %v314_v38  ;;  %v375_v5 = vmul.f32 (!%p499_p7), %v615_v51, %v359_v62 }
  0xff   : > { %632 = vrcp.f32 %v320_v44  ;;  %v361_v6 = vsub.f32 2.0, %v345_v63  ;;  %390 = vst.msk [vmem:[%s883_s6 + $0x8] sm:$0xff] %vm288_vm1, %v374_v1  ;;  %v376_v9 = vmul.f32 %v617_v54, %v360_v2 }
 0x100   : > { %v937_v47 = vld [vmem:[#allocation2 + $0x68] sm:$0xff]  ;;  %v623_v0 = vpop.eup %622  ;;  %v362_v10 = vsub.f32 2.0, %v346_v3  ;;  %391 = vst.msk [vmem:[%s883_s6 + $0x10] sm:$0xff] %vm288_vm1, %v375_v5 }
 0x101   : > { %v935_v45 = vld [vmem:[#allocation2 + $0x60] sm:$0xff]  ;;  %v625_v4 = vpop.eup %624  ;;  %v347_v7 = vmul.f32 %v623_v0, %v315_v39  ;;  %v377_v13 = vmul.f32 %v619_v57, %v361_v6  ;;  %392 = vst.msk [vmem:[%s883_s6 + $0x18] sm:$0xff] %vm288_vm1, %v376_v9 }
 0x102   : > { %634 = vrcp.f32 %v935_v45  ;;  %v348_v11 = vmul.f32 %v625_v4, %v316_v40  ;;  %v378_v17 = vmul.f32 %v621_v60, %v362_v10 }
 0x103   : > { %636 = vrcp.f32 %v937_v47  ;;  %v363_v14 = vsub.f32 2.0, %v347_v7  ;;  %393 = vst.msk [vmem:[%s883_s6 + $0x20] sm:$0xff] %vm288_vm1, %v377_v13 }
 0x104   : > { %v942_v53 = vld [vmem:[#allocation2 + $0x78] sm:$0xff]  ;;  %v627_v8 = vpop.eup %626  ;;  %v364_v18 = vsub.f32 2.0, %v348_v11  ;;  %394 = vst.msk [vmem:[%s883_s6 + $0x28] sm:$0xff] %vm288_vm1, %v378_v17 }
 0x105   : > { %v939_v50 = vld [vmem:[#allocation2 + $0x70] sm:$0xff]  ;;  %v629_v12 = vpop.eup %628  ;;  %v349_v15 = vmul.f32 %v627_v8, %v317_v41  ;;  %v379_v21 = vmul.f32 %v623_v0, %v363_v14 }
 0x106   : > { %638 = vrcp.f32 %v939_v50  ;;  %v350_v19 = vmul.f32 %v629_v12, %v318_v42  ;;  %v380_v25 = vmul.f32 %v625_v4, %v364_v18 }
 0x107   : > { %640 = vrcp.f32 %v942_v53  ;;  %v365_v22 = vsub.f32 2.0, %v349_v15  ;;  %395 = vst.msk [vmem:[%s883_s6 + $0x30] sm:$0xff] %vm288_vm1, %v379_v21 }
 0x108   : > { %v631_v16 = vpop.eup %630  ;;  %v366_v26 = vsub.f32 2.0, %v350_v19  ;;  %396 = vst.msk [vmem:[%s883_s6 + $0x38] sm:$0xff] %vm288_vm1, %v380_v25 }
 0x109   : > { %v633_v20 = vpop.eup %632  ;;  %v351_v23 = vmul.f32 %v631_v16, %v319_v43  ;;  %v381_v29 = vmul.f32 %v627_v8, %v365_v22 }
 0x10a   : > { %v352_v27 = vmul.f32 %v633_v20, %v320_v44  ;;  %v382_v33 = vmul.f32 %v629_v12, %v366_v26 }
 0x10b   : > { %v367_v30 = vsub.f32 2.0, %v351_v23  ;;  %397 = vst.msk [vmem:[%s883_s6 + $0x40] sm:$0xff] %vm288_vm1, %v381_v29 }
 0x10c   : > { %v635_v24 = vpop.eup %634  ;;  %v368_v34 = vsub.f32 2.0, %v352_v27  ;;  %398 = vst.msk [vmem:[%s883_s6 + $0x48] sm:$0xff] %vm288_vm1, %v382_v33 }
 0x10d   : > { %v637_v28 = vpop.eup %636  ;;  %v353_v31 = vmul.f32 %v635_v24, %v935_v45  ;;  %v383_v37 = vmul.f32 %v631_v16, %v367_v30 }
 0x10e   : > { %v354_v35 = vmul.f32 %v637_v28, %v937_v47  ;;  %v384_v40 = vmul.f32 %v633_v20, %v368_v34 }
 0x10f   : > { %v369_v38 = vsub.f32 2.0, %v353_v31  ;;  %399 = vst.msk [vmem:[%s883_s6 + $0x50] sm:$0xff] %vm288_vm1, %v383_v37 }
 0x110   : > { %v639_v32 = vpop.eup %638  ;;  %v370_v41 = vsub.f32 2.0, %v354_v35  ;;  %400 = vst.msk [vmem:[%s883_s6 + $0x58] sm:$0xff] %vm288_vm1, %v384_v40 }
 0x111   : > { %v641_v36 = vpop.eup %640  ;;  %v355_v39 = vmul.f32 %v639_v32, %v939_v50  ;;  %v385_v43 = vmul.f32 %v635_v24, %v369_v38 }
 0x112   : > { %v356_v42 = vmul.f32 %v641_v36, %v942_v53  ;;  %v386_v45 = vmul.f32 %v637_v28, %v370_v41 }
 0x113   : > { %v371_v44 = vsub.f32 2.0, %v355_v39  ;;  %401 = vst.msk [vmem:[%s883_s6 + $0x60] sm:$0xff] %vm288_vm1, %v385_v43 }
 0x114   : > { %v372_v46 = vsub.f32 2.0, %v356_v42  ;;  %402 = vst.msk [vmem:[%s883_s6 + $0x68] sm:$0xff] %vm288_vm1, %v386_v45 }
 0x115   : > { %v387_v47 = vmul.f32 %v639_v32, %v371_v44 }
 0x116   : > { %v388_v48 = vmul.f32 %v641_v36, %v372_v46 }
 0x117   : > { %403 = vst.msk [vmem:[%s883_s6 + $0x70] sm:$0xff] %vm288_vm1, %v387_v47 }
 0x118   : > { %404 = vst.msk [vmem:[%s883_s6 + $0x78] sm:$0xff] %vm288_vm1, %v388_v48 }
 0x119 PF: > { %s14_s13 = sadd.s32 1, %s738_s13   ;;  %s1013_s6 = smov %s714_s7 }
 0x11a   : > { %p11_p6 = scmp.ge.s32.totalorder %s14_s13, 6   ;;  %s1014_s7 = smov %s718_s8 }
 0x11b   : > { %s1015_s8 = smov %s822_s26  ;;  %s1016_s9 = smov %s730_s11 }
 0x11c   : > { %s1017_s10 = smov %s734_s12  ;;  %s1018_s11 = smov %s1021_s15 }
 0x11d   : > { %s1019_s12 = smov %s1025_s16  ;;  %13 = sbr.rel (!%p11_p6) target bundleno = 5 (0x5), region = 72 }
 0x124   :  { %427 = vsyncpa [#allocation4], 1 }
 0x125   :  { %429 = vsyncpa [#allocation4 + $0x1], 1 }

</bundles_post_ra>
